<compile_context>
chip_gen: v5e
topology: v5e:2x2
jax: 0.10.0
libtpu: 0.0.40
codegen_flags: <defaults>
</compile_context>

<pallas_src>
import functools

import jax
import jax.numpy as jnp
import numpy as np
from jax.experimental import pallas as pl
from jax.experimental.pallas import tpu as pltpu


def _energy_kernel(keep_ref, obj_ref, logits_ref, prob_ref, *, temperature):
    """prob = exp(-T * obj) * sigmoid(logits) * keep   (f32 math on VPU/EUP)."""
    logits = logits_ref[...].astype(jnp.float32)                            # (TM, C_pad)
    keep = keep_ref[...]                                                    # (1,  C_pad)
    logit_dist = jnp.exp(-temperature * obj_ref[...].astype(jnp.float32))   # (TM, 1)
    prob_ref[...] = (logit_dist * jax.nn.sigmoid(logits) * keep).astype(prob_ref.dtype)


@functools.partial(jax.jit, static_argnames=("temperature", "tm"))
def _energy_prob_impl(pred_logits, pred_obj, keep_mask, *, temperature, tm):
    B, Q, C = pred_logits.shape
    rows = B * Q
    out_dtype = jnp.promote_types(pred_logits.dtype, pred_obj.dtype)

    # Lane-dense class dim: pad C up to a multiple of 128 (unmasked vst).
    C_pad = ((C + 127) // 128) * 128

    # Row tile: multiple of 8, capped so ~double-buffered in + out f32 tiles
    # stay well inside the default scoped VMEM on all of v5e/v6e/v7x.
    vmem_budget = 24 * 1024 * 1024
    tm_cap = max(8, (vmem_budget // (6 * C_pad * 4)) // 8 * 8)
    tm = int(max(8, min(tm, tm_cap, ((rows + 7) // 8) * 8)))
    rows_pad = ((rows + tm - 1) // tm) * tm

    logits2 = pred_logits.reshape(rows, C)
    obj2 = pred_obj.reshape(rows, 1)
    if rows_pad != rows or C_pad != C:
        logits2 = jnp.pad(logits2, ((0, rows_pad - rows), (0, C_pad - C)))
    if rows_pad != rows:
        obj2 = jnp.pad(obj2, ((0, rows_pad - rows), (0, 0)))
    # Padded classes get keep == 0 -> output exactly 0 there.
    keep2 = jnp.zeros((1, C_pad), jnp.float32).at[0, :C].set(
        keep_mask.astype(jnp.float32))

    kernel = functools.partial(_energy_kernel, temperature=float(temperature))

    out = pl.pallas_call(
        kernel,
        out_shape=jax.ShapeDtypeStruct((rows_pad, C_pad), out_dtype),
        grid_spec=pltpu.PrefetchScalarGridSpec(
            num_scalar_prefetch=0,
            grid=(rows_pad // tm,),
            in_specs=[
                pl.BlockSpec((1, C_pad), lambda i: (0, 0)),    # keep mask (resident)
                pl.BlockSpec((tm, 1), lambda i: (i, 0)),       # pred_obj column
                pl.BlockSpec((tm, C_pad), lambda i: (i, 0)),   # pred_logits tile
            ],
            out_specs=pl.BlockSpec((tm, C_pad), lambda i: (i, 0)),
        ),
        compiler_params=pltpu.CompilerParams(
            dimension_semantics=("parallel",),
        ),
    )(keep2, obj2, logits2)

    return out[:rows, :C].reshape(B, Q, C)


def energy_prob(pred_logits, pred_obj, keep_mask, temperature=1.0, tm=1024):
    """prob = exp(-T * pred_obj)[..., None] * sigmoid(masked_logits).

    pred_logits: (B, Q, C) float (f32 or bf16)
    pred_obj:    (B, Q)    float
    keep_mask:   (C,)      float, 0.0 at invalid class logits, 1.0 otherwise
    """
    return _energy_prob_impl(pred_logits, pred_obj, keep_mask,
                             temperature=float(temperature), tm=int(tm))


class ExemplarSelection:
    """JAX/Pallas port of the PyTorch ExemplarSelection module."""

    def __init__(self, num_classes, matcher, invalid_cls_logits, temperature=1.0):
        self.num_classes = num_classes
        self.matcher = matcher
        self.invalid_cls_logits = list(invalid_cls_logits)
        self.temperature = float(temperature)
        self._keep_mask_cache = {}   # C -> device keep-mask (cached; no per-call upload)

    def _keep_mask(self, C):
        m = self._keep_mask_cache.get(C)
        if m is None:
            keep = np.ones((C,), dtype=np.float32)
            if len(self.invalid_cls_logits) > 0:
                keep[np.asarray(self.invalid_cls_logits, dtype=np.int64)] = 0.0
            m = jnp.asarray(keep)
            self._keep_mask_cache[C] = m
        return m

    def calc_energy_per_image(self, outputs, targets, indices):
        out_logits = outputs['pred_logits']   # (B, Q, C)
        pred_obj = outputs['pred_obj']        # (B, Q)
        B, Q, C = out_logits.shape

        # Hot path in Pallas (one jitted executable: pad + kernel + slice).
        prob = energy_prob(out_logits, pred_obj, self._keep_mask(C), self.temperature)

        # Batch all per-image gathers into one device gather + one host transfer.
        img_ids, counts = [], []
        b_all, q_all, l_all = [], [], []
        for i in range(len(targets)):
            img_ids.append(''.join(chr(int(c)) for c in targets[i]['org_image_id']))
            labels = np.asarray(targets[i]['labels'], dtype=np.int32)
            q_idx = np.asarray(indices[i][0], dtype=np.int32)
            n = int(labels.shape[0])
            counts.append(n)
            b_all.append(np.full((n,), i, dtype=np.int32))
            q_all.append(q_idx)
            l_all.append(labels)

        total = int(np.sum(counts)) if counts else 0
        if total > 0:
            b_cat = jnp.asarray(np.concatenate(b_all))
            q_cat = jnp.asarray(np.concatenate(q_all))
            l_cat = jnp.asarray(np.concatenate(l_all))
            scores_all = np.asarray(prob[b_cat, q_cat, l_cat])   # single D2H transfer
        else:
            scores_all = np.zeros((0,), dtype=np.float32)

        per_image = np.split(scores_all, np.cumsum(counts)[:-1]) if counts else []

        image_sorted_scores = {}
        for i, img_id in enumerate(img_ids):
            image_sorted_scores[img_id] = {
                'labels': np.asarray(targets[i]['labels']),
                'scores': per_image[i],
            }
        return [image_sorted_scores]

    def __call__(self, samples, outputs, targets):
        outputs_without_aux = {
            k: v for k, v in outputs.items()
            if k != 'aux_outputs' and k != 'enc_outputs' and k != 'pred_obj'
        }
        indices = self.matcher(outputs_without_aux, targets)
        return self.calc_energy_per_image(outputs, targets, indices)


# TODO(synk): the Hungarian matcher has no clean Pallas equivalent; a simple
# deterministic stub matcher is used here (assigns query i to target i).
def _stub_matcher(outputs_without_aux, targets):
    indices = []
    for t in targets:
        n = len(t['labels'])
        indices.append((np.arange(n, dtype=np.int32), np.arange(n, dtype=np.int32)))
    return indices


if __name__ == "__main__":
    key = jax.random.PRNGKey(0)
    B, Q, C = 2, 8, 16                     # batch, queries, num class logits
    PREV_CLS, CUR_CLS = 8, 4               # seen classes = 12
    invalid_cls_logits = list(range(PREV_CLS + CUR_CLS, C - 1))  # unseen class logits

    k1, k2, k3 = jax.random.split(key, 3)
    pred_logits = jax.random.normal(k1, (B, Q, C), dtype=jnp.float32)
    pred_obj = jax.random.normal(k2, (B, Q), dtype=jnp.float32)
    pred_boxes = jax.random.uniform(k3, (B, Q, 4), dtype=jnp.float32)

    outputs = {
        'pred_logits': pred_logits,
        'pred_obj': pred_obj,
        'pred_boxes': pred_boxes,
    }

    targets = [
        {
            'labels': np.array([1, 5, 9], dtype=np.int32),
            'org_image_id': np.array([ord(c) for c in "img_000"], dtype=np.int32),
        },
        {
            'labels': np.array([0, 11], dtype=np.int32),
            'org_image_id': np.array([ord(c) for c in "img_001"], dtype=np.int32),
        },
    ]

    module = ExemplarSelection(
        num_classes=C,
        matcher=_stub_matcher,
        invalid_cls_logits=invalid_cls_logits,
        temperature=1.0,
    )

    # Run the Pallas kernel directly and block on it.
    keep_mask = np.ones((C,), dtype=np.float32)
    keep_mask[invalid_cls_logits] = 0.0
    prob = energy_prob(pred_logits, pred_obj, jnp.asarray(keep_mask), 1.0)
    jax.block_until_ready(prob)

    # Reference check against plain JAX (original -1e11 masking semantics).
    masked_ref = pred_logits.at[:, :, jnp.asarray(invalid_cls_logits)].set(-1e11)
    prob_ref = jnp.exp(-1.0 * pred_obj)[..., None] * jax.nn.sigmoid(masked_ref)
    np.testing.assert_allclose(np.asarray(prob), np.asarray(prob_ref),
                               rtol=1e-5, atol=1e-6)

    # Full module forward (matcher stub + batched gather glue).
    result = module(samples=None, outputs=outputs, targets=targets)
    assert isinstance(result, list) and len(result) == 1
    assert set(result[0].keys()) == {"img_000", "img_001"}
    assert result[0]["img_000"]["scores"].shape == (3,)
    assert result[0]["img_001"]["scores"].shape == (2,)

    # Gathered scores match the reference gather.
    ref0 = np.asarray(prob_ref)[0][np.arange(3), targets[0]['labels']]
    ref1 = np.asarray(prob_ref)[1][np.arange(2), targets[1]['labels']]
    np.testing.assert_allclose(result[0]["img_000"]["scores"], ref0, rtol=1e-5, atol=1e-6)
    np.testing.assert_allclose(result[0]["img_001"]["scores"], ref1, rtol=1e-5, atol=1e-6)

    print("KERNEL_OK")
</pallas_src>

<mosaic_0001>
module attributes {stable_mosaic.version = 11 : i64} {
  func.func @_energy_kernel(%arg0: i32, %arg1: memref<1x128xf32, #tpu.memory_space<vmem>>, %arg2: memref<16x1xf32, #tpu.memory_space<vmem>>, %arg3: memref<16x128xf32, #tpu.memory_space<vmem>>, %arg4: memref<16x128xf32, #tpu.memory_space<vmem>>) attributes {dimension_semantics = [#tpu.dimension_semantics<parallel>], iteration_bounds = array<i64: 1>, scalar_prefetch = 0 : i64, scratch_operands = 0 : i64, tpu.core_type = #tpu.core_type<tc>, window_params = [{pipeline_mode = #tpu.pipeline_mode<synchronous>, transform_indices = @transform_0, window_bounds = array<i64: 1, 128>}, {transform_indices = @transform_1, window_bounds = array<i64: 16, 1>}, {transform_indices = @transform_2, window_bounds = array<i64: 16, 128>}, {transform_indices = @transform_3, window_bounds = array<i64: 16, 128>}]} {
    %c0 = arith.constant 0 : index
    %c0_0 = arith.constant 0 : index
    %0 = vector.load %arg3[%c0, %c0_0] : memref<16x128xf32, #tpu.memory_space<vmem>>, vector<16x128xf32>
    %c0_1 = arith.constant 0 : index
    %c0_2 = arith.constant 0 : index
    %1 = vector.load %arg1[%c0_1, %c0_2] : memref<1x128xf32, #tpu.memory_space<vmem>>, vector<1x128xf32>
    %c0_3 = arith.constant 0 : index
    %c0_4 = arith.constant 0 : index
    %2 = vector.load %arg2[%c0_3, %c0_4] : memref<16x1xf32, #tpu.memory_space<vmem>>, vector<16x1xf32>
    %cst = arith.constant -1.000000e+00 : f32
    %3 = vector.broadcast %cst : f32 to vector<16x1xf32>
    %4 = arith.mulf %3, %2 : vector<16x1xf32>
    %5 = math.exp %4 : vector<16x1xf32>
    %6 = arith.negf %0 : vector<16x128xf32>
    %7 = math.exp %6 : vector<16x128xf32>
    %cst_5 = arith.constant 1.000000e+00 : f32
    %8 = vector.broadcast %cst_5 : f32 to vector<16x128xf32>
    %9 = arith.addf %8, %7 : vector<16x128xf32>
    %10 = arith.divf %8, %9 : vector<16x128xf32>
    %11 = vector.broadcast %5 : vector<16x1xf32> to vector<16x128xf32>
    %12 = arith.mulf %11, %10 : vector<16x128xf32>
    %13 = vector.broadcast %1 : vector<1x128xf32> to vector<16x128xf32>
    %14 = arith.mulf %12, %13 : vector<16x128xf32>
    %c0_6 = arith.constant 0 : index
    %c0_7 = arith.constant 0 : index
    %15 = vector.load %arg4[%c0_6, %c0_7] : memref<16x128xf32, #tpu.memory_space<vmem>>, vector<16x128xf32>
    tpu.vector_store %arg4[%c0_6, %c0_7], %14 {strides = array<i32>} : memref<16x128xf32, #tpu.memory_space<vmem>>, vector<16x128xf32>,
    return
  }
  func.func @transform_0(%arg0: i32) -> (i32, i32) {
    %c0_i32 = arith.constant 0 : i32
    %c0_i32_0 = arith.constant 0 : i32
    %c0_i32_1 = arith.constant 0 : i32
    return %c0_i32, %c0_i32_0 : i32, i32
  }
  func.func @transform_1(%arg0: i32) -> (i32, i32) {
    %c0_i32 = arith.constant 0 : i32
    %c0_i32_0 = arith.constant 0 : i32
    return %arg0, %c0_i32 : i32, i32
  }
  func.func @transform_2(%arg0: i32) -> (i32, i32) {
    %c0_i32 = arith.constant 0 : i32
    %c0_i32_0 = arith.constant 0 : i32
    return %arg0, %c0_i32 : i32, i32
  }
  func.func @transform_3(%arg0: i32) -> (i32, i32) {
    %c0_i32 = arith.constant 0 : i32
    %c0_i32_0 = arith.constant 0 : i32
    return %arg0, %c0_i32 : i32, i32
  }
}

</mosaic_0001>

<bundles_post_ra>
// kernel: _energy_prob_impl.1
= control target key start
LH: loop header
LB: loop body
LE: loop exit
PB: predicated region body
PF: predicated region fallthrough
CT: control target
= control target key end

     0   :  { %v103_v0 = vmov 0   ;;  %s145_s1 = inlined_call_operand.vmem [shape: f32[16,1], index: 1, kind: input, shape index: {}]   ;;  %s146_s0 = inlined_call_operand.vmem [shape: f32[1,128], index: 0, kind: input, shape index: {}]   ;;  %s147_s2 = inlined_call_operand.vmem [shape: f32[16,128], index: 2, kind: input, shape index: {}]   ;;  %s148_s3 = inlined_call_operand.vmem [shape: f32[16,128], index: 3, kind: output, shape index: {}]  }
   0x1   :  { %89 = vset.pattern.permute.xlu0 %v103_v0  ;;  %v17_v1 = vld [vmem:[%s145_s1] sm:$0xff]  ;;  %v18_v2 = vld [vmem:[%s145_s1 + $0x8] sm:$0xff] }
   0x2   :  { %v19_v3 = vmul.f32 -1.0, %v17_v1  ;;  %v20_v4 = vmul.f32 -1.0, %v18_v2  ;;  %v14_v9 = vld [vmem:[%s147_s2] sm:$0xff]  ;;  %v15_v11 = vld [vmem:[%s147_s2 + $0x8] sm:$0xff] }
   0x3   :  { %v86_v10 = vmul.f32 -1.442695, %v14_v9  ;;  %v87_v12 = vmul.f32 -1.442695, %v15_v11  ;;  %v90_v32 = vld [vmem:[%s146_s0] ss:$0 sm:$0xff] }
   0x4   :  { %v21_v5 = vmul.f32 1.442695, %v19_v3  ;;  %v23_v6 = vmul.f32 1.442695, %v20_v4 }
   0x6   :  { %91 = vpow2.f32 %v21_v5 }
   0x7   :  { %93 = vpow2.f32 %v23_v6 }
   0x8   :  { %95 = vpow2.f32 %v86_v10 }
   0x9   :  { %97 = vpow2.f32 %v87_v12 }
   0xc   :  { %v92_v7 = vpop.eup %91 }
   0xd   :  { %65 = vperm.xlu0 %89, %v92_v7   ;;  %v94_v8 = vpop.eup %93 }
   0xe   :  { %v96_v13 = vpop.eup %95 }
   0xf   :  { %v31_v14 = vadd.f32 1.0, %v96_v13  ;;  %v98_v15 = vpop.eup %97 }
  0x10   :  { %v32_v16 = vadd.f32 1.0, %v98_v15 }
  0x11   :  { %99 = vrcp.f32 %v31_v14  ;;  %vm38_vm0 = vweird.f32 %v31_v14  ;;  %v44_v23 = vand.u32 2147483648, %v31_v14  ;;  %v42_v25 = vand.u32 2147483647, %v31_v14 }
  0x12   :  { %101 = vrcp.f32 %v32_v16  ;;  %vm53_vm4 = vweird.f32 %v32_v16  ;;  %v59_v31 = vand.u32 2147483648, %v32_v16  ;;  %v57_v34 = vand.u32 2147483647, %v32_v16 }
  0x13   :  { %v45_v27 = vor.u32 1.1754944e-38, %v44_v23  ;;  %vm43_vm3 = vcmp.eq.f32.partialorder %v42_v25, 8.507059e+37 }
  0x14   :  { %v60_v37 = vor.u32 1.1754944e-38, %v59_v31  ;;  %vm58_vm7 = vcmp.eq.f32.partialorder %v57_v34, 8.507059e+37 }
  0x15   :  { %70 = vperm.xlu0 %89, %v94_v8  }
  0x17   :  { %v100_v17 = vpop.eup %99 }
  0x18   :  { %v34_v18 = vmul.f32 %v100_v17, %v31_v14  ;;  %v102_v20 = vpop.eup %101  ;;  %vm39_vm1 = vweird.f32 %v100_v17 }
  0x19   :  { %v49_v22 = vmul.f32 %v102_v20, %v32_v16  ;;  %vm40_vm2 = vmor %vm38_vm0, %vm39_vm1  ;;  %vm54_vm5 = vweird.f32 %v102_v20 }
  0x1a   :  { %v35_v19 = vsub.f32 1.0, %v34_v18  ;;  %vm55_vm6 = vmor %vm53_vm4, %vm54_vm5 }
  0x1b   :  { %v50_v26 = vsub.f32 1.0, %v49_v22 }
  0x1c   :  { %v36_v21 = vmul.f32 %v100_v17, %v35_v19 }
  0x1d   :  { %v51_v29 = vmul.f32 %v102_v20, %v50_v26 }
  0x1e   :  { %v37_v24 = vadd.f32 %v100_v17, %v36_v21 }
  0x1f   :  { %v52_v33 = vadd.f32 %v102_v20, %v51_v29 }
  0x20   :  { %v41_v28 = vsel %vm40_vm2, %v100_v17, %v37_v24 }
  0x21   :  { %v46_v30 = vsel %vm43_vm3, %v45_v27, %v41_v28  ;;  %v56_v39 = vsel %vm55_vm6, %v102_v20, %v52_v33 }
  0x22   :  { %v61_v40 = vsel %vm58_vm7, %v60_v37, %v56_v39 }
  0x7f   :  { %v66_v35 = vpop.permute.xlu0 %65 }
  0x80   :  { %v73_v36 = vmul.f32 %v66_v35, %v46_v30 }
  0x82   :  { %v78_v38 = vmul.f32 %v90_v32, %v73_v36 }
  0x84   :  { %80 = vst [vmem:[%s148_s3] sm:$0xff] %v78_v38 }
  0x87   :  { %v71_v41 = vpop.permute.xlu0 %70 }
  0x88   :  { %v74_v42 = vmul.f32 %v71_v41, %v61_v40 }
  0x8a   :  { %v79_v43 = vmul.f32 %v90_v32, %v74_v42 }
  0x8c   :  { %81 = vst [vmem:[%s148_s3 + $0x8] sm:$0xff] %v79_v43 }

</bundles_post_ra>
